<compile_context>
chip_gen: v5e
topology: v5e:2x2
jax: 0.10.0
libtpu: 0.0.40
codegen_flags: <defaults>
</compile_context>

<pallas_src>
import jax
import jax.numpy as jnp
from jax.experimental import pallas as pl
from jax.experimental.pallas import tpu as pltpu


def _sentiment_kernel(x_ref, w2_ref, b2_ref, w3_ref, b3_ref, o_ref):
    # fc2: [TILE_B, D] @ [D, 64] + [1, 64], then ReLU (f32 MXU accumulation).
    h = jnp.dot(x_ref[...], w2_ref[...], preferred_element_type=jnp.float32)
    h = jnp.maximum(h + b2_ref[...], 0.0)
    # Dropout(0.3): identity at inference time.
    # fc3: [TILE_B, 64] @ [64, 3] + [1, 3].  Native 3-wide output block (last
    # dim equals the full array dim, so the store DMA is contiguous); the few
    # masked vst per tile are negligible vs the HBM bytes saved.
    out = jnp.dot(h, w3_ref[...], preferred_element_type=jnp.float32)
    o_ref[...] = (out + b3_ref[...]).astype(o_ref.dtype)


def _choose_tile_b(B, D, H, C):
    """Pick a batch tile from a VMEM budget, balanced over >=2 grid steps.

    Budget against the smallest default scoped-VMEM limit (v5e: 16 MiB) with
    headroom, so the same tile also fits v6e (32 MiB scoped / 128 MiB phys)
    and v7x (32 MiB scoped / 64 MiB phys) without touching vmem_limit_bytes.
    Double-buffered x/out blocks plus the (conservatively double-buffered)
    resident weights must fit.
    """
    weight_bytes = 2 * 4 * (D * H + H + H * C + C)
    budget = max(1 << 20, 12 * 1024 * 1024 - weight_bytes)
    bytes_per_row = 2 * 4 * (D + C)                 # 2 buffers, f32
    cap = max(8, (budget // bytes_per_row) // 8 * 8)
    cap = min(cap, 8192)                            # step overhead amortized
    if B <= 8:
        return 8
    # >=2 balanced steps: v7x megacore gets both TensorCores busy via the
    # "parallel" grid axis, and the last tile wastes <8 rows instead of
    # up to a full tile.
    steps = max(2, pl.cdiv(B, cap))
    tile = max(8, ((pl.cdiv(B, steps) + 7) // 8) * 8)
    return min(tile, cap)


def sentiment_detection_layer2(claim_embed, w2, b2, w3, b3):
    """claim_embed: [B, D] f32.  w2: [D, 64], b2: [64], w3: [64, 3], b3: [3]."""
    B, D = claim_embed.shape
    H = w2.shape[1]          # 64
    C = w3.shape[1]          # 3

    b2_2d = b2.reshape(1, H)
    b3_2d = b3.reshape(1, C)

    tile_b = _choose_tile_b(B, D, H, C)
    # Ragged grid: no wrapper-side jnp.pad (which would re-read/re-write the
    # whole input in HBM); Pallas masks the boundary block's stores.
    grid = (pl.cdiv(B, tile_b),)

    flops = 2 * B * (D * H + H * C)
    bytes_accessed = 4 * (B * D + D * H + H + H * C + C + B * C)

    return pl.pallas_call(
        _sentiment_kernel,
        out_shape=jax.ShapeDtypeStruct((B, C), claim_embed.dtype),
        grid_spec=pltpu.PrefetchScalarGridSpec(
            num_scalar_prefetch=0,
            grid=grid,
            in_specs=[
                pl.BlockSpec((tile_b, D), lambda i: (i, 0)),   # x: tiled over B
                pl.BlockSpec((D, H), lambda i: (0, 0)),        # w2: resident
                pl.BlockSpec((1, H), lambda i: (0, 0)),        # b2: resident
                pl.BlockSpec((H, C), lambda i: (0, 0)),        # w3: resident
                pl.BlockSpec((1, C), lambda i: (0, 0)),        # b3: resident
            ],
            out_specs=pl.BlockSpec((tile_b, C), lambda i: (i, 0)),
        ),
        compiler_params=pltpu.CompilerParams(
            dimension_semantics=("parallel",)),   # v7x megacore sharding
        cost_estimate=pl.CostEstimate(
            flops=flops, transcendentals=0, bytes_accessed=bytes_accessed),
    )(claim_embed, w2, b2_2d, w3, b3_2d)


def _reference(claim_embed, w2, b2, w3, b3):
    h = jnp.maximum(claim_embed @ w2 + b2, 0.0)
    return h @ w3 + b3


if __name__ == "__main__":
    input_dim = 32
    hidden = 64
    num_classes = 3

    key = jax.random.PRNGKey(0)
    k_x, k_w2, k_b2, k_w3, k_b3, k_x2 = jax.random.split(key, 6)

    # Deterministic parameter init (stored transposed relative to PyTorch's
    # [out_features, in_features] layout, i.e. [in, out]).
    w2 = jax.random.normal(k_w2, (input_dim, hidden), dtype=jnp.float32) * 0.05
    b2 = jax.random.normal(k_b2, (hidden,), dtype=jnp.float32) * 0.05
    w3 = jax.random.normal(k_w3, (hidden, num_classes), dtype=jnp.float32) * 0.05
    b3 = jax.random.normal(k_b3, (num_classes,), dtype=jnp.float32) * 0.05

    # Test 1: small batch (single tile).
    batch = 8
    claim_embed = jax.random.normal(k_x, (batch, input_dim), dtype=jnp.float32)
    out = jax.block_until_ready(
        sentiment_detection_layer2(claim_embed, w2, b2, w3, b3))
    ref = _reference(claim_embed, w2, b2, w3, b3)
    assert out.shape == (batch, num_classes)
    assert jnp.allclose(out, ref, atol=1e-5, rtol=1e-5)

    # Test 2: batch not a multiple of the tile (exercises the ragged grid /
    # masked boundary-block store path, no wrapper pad or slice).
    batch2 = 37
    claim_embed2 = jax.random.normal(k_x2, (batch2, input_dim), dtype=jnp.float32)
    out2 = jax.block_until_ready(
        sentiment_detection_layer2(claim_embed2, w2, b2, w3, b3))
    ref2 = _reference(claim_embed2, w2, b2, w3, b3)
    assert out2.shape == (batch2, num_classes)
    assert jnp.allclose(out2, ref2, atol=1e-5, rtol=1e-5)

    print("KERNEL_OK")
</pallas_src>

<mosaic_0001>
module attributes {stable_mosaic.version = 11 : i64} {
  func.func @_sentiment_kernel(%arg0: i32, %arg1: memref<8x32xf32, #tpu.memory_space<vmem>>, %arg2: memref<32x64xf32, #tpu.memory_space<vmem>>, %arg3: memref<1x64xf32, #tpu.memory_space<vmem>>, %arg4: memref<64x3xf32, #tpu.memory_space<vmem>>, %arg5: memref<1x3xf32, #tpu.memory_space<vmem>>, %arg6: memref<8x3xf32, #tpu.memory_space<vmem>>) attributes {dimension_semantics = [#tpu.dimension_semantics<parallel>], iteration_bounds = array<i64: 1>, scalar_prefetch = 0 : i64, scratch_operands = 0 : i64, tpu.core_type = #tpu.core_type<tc>, window_params = [{transform_indices = @transform_0, window_bounds = array<i64: 8, 32>}, {pipeline_mode = #tpu.pipeline_mode<synchronous>, transform_indices = @transform_1, window_bounds = array<i64: 32, 64>}, {pipeline_mode = #tpu.pipeline_mode<synchronous>, transform_indices = @transform_2, window_bounds = array<i64: 1, 64>}, {pipeline_mode = #tpu.pipeline_mode<synchronous>, transform_indices = @transform_3, window_bounds = array<i64: 64, 3>}, {pipeline_mode = #tpu.pipeline_mode<synchronous>, transform_indices = @transform_4, window_bounds = array<i64: 1, 3>}, {transform_indices = @transform_5, window_bounds = array<i64: 8, 3>}]} {
    %c0 = arith.constant 0 : index
    %c0_0 = arith.constant 0 : index
    %0 = vector.load %arg1[%c0, %c0_0] : memref<8x32xf32, #tpu.memory_space<vmem>>, vector<8x32xf32>
    %c0_1 = arith.constant 0 : index
    %c0_2 = arith.constant 0 : index
    %1 = vector.load %arg2[%c0_1, %c0_2] : memref<32x64xf32, #tpu.memory_space<vmem>>, vector<32x64xf32>
    %cst = arith.constant dense<0.000000e+00> : vector<8x64xf32>
    %2 = tpu.matmul %0, %1, %cst {dimension_numbers = #tpu.dot_dimension_numbers<[1], [0], [0], [1], [0, 0, 1, 1], [], []>} : vector<8x32xf32>, vector<32x64xf32>, vector<8x64xf32> -> vector<8x64xf32>
    %c0_3 = arith.constant 0 : index
    %c0_4 = arith.constant 0 : index
    %3 = vector.load %arg3[%c0_3, %c0_4] : memref<1x64xf32, #tpu.memory_space<vmem>>, vector<1x64xf32>
    %4 = vector.broadcast %3 : vector<1x64xf32> to vector<8x64xf32>
    %5 = arith.addf %2, %4 : vector<8x64xf32>
    %cst_5 = arith.constant 0.000000e+00 : f32
    %6 = vector.broadcast %cst_5 : f32 to vector<8x64xf32>
    %7 = arith.maximumf %5, %6 : vector<8x64xf32>
    %c0_6 = arith.constant 0 : index
    %c0_7 = arith.constant 0 : index
    %8 = vector.load %arg4[%c0_6, %c0_7] : memref<64x3xf32, #tpu.memory_space<vmem>>, vector<64x3xf32>
    %cst_8 = arith.constant dense<0.000000e+00> : vector<8x3xf32>
    %9 = tpu.matmul %7, %8, %cst_8 {dimension_numbers = #tpu.dot_dimension_numbers<[1], [0], [0], [1], [0, 0, 1, 1], [], []>} : vector<8x64xf32>, vector<64x3xf32>, vector<8x3xf32> -> vector<8x3xf32>
    %c0_9 = arith.constant 0 : index
    %c0_10 = arith.constant 0 : index
    %10 = vector.load %arg5[%c0_9, %c0_10] : memref<1x3xf32, #tpu.memory_space<vmem>>, vector<1x3xf32>
    %11 = vector.broadcast %10 : vector<1x3xf32> to vector<8x3xf32>
    %12 = arith.addf %9, %11 : vector<8x3xf32>
    %c0_11 = arith.constant 0 : index
    %c0_12 = arith.constant 0 : index
    %13 = vector.load %arg6[%c0_11, %c0_12] : memref<8x3xf32, #tpu.memory_space<vmem>>, vector<8x3xf32>
    tpu.vector_store %arg6[%c0_11, %c0_12], %12 {strides = array<i32>} : memref<8x3xf32, #tpu.memory_space<vmem>>, vector<8x3xf32>,
    return
  }
  func.func @transform_0(%arg0: i32) -> (i32, i32) {
    %c0_i32 = arith.constant 0 : i32
    %c0_i32_0 = arith.constant 0 : i32
    return %arg0, %c0_i32 : i32, i32
  }
  func.func @transform_1(%arg0: i32) -> (i32, i32) {
    %c0_i32 = arith.constant 0 : i32
    %c0_i32_0 = arith.constant 0 : i32
    %c0_i32_1 = arith.constant 0 : i32
    return %c0_i32, %c0_i32_0 : i32, i32
  }
  func.func @transform_2(%arg0: i32) -> (i32, i32) {
    %c0_i32 = arith.constant 0 : i32
    %c0_i32_0 = arith.constant 0 : i32
    %c0_i32_1 = arith.constant 0 : i32
    return %c0_i32, %c0_i32_0 : i32, i32
  }
  func.func @transform_3(%arg0: i32) -> (i32, i32) {
    %c0_i32 = arith.constant 0 : i32
    %c0_i32_0 = arith.constant 0 : i32
    %c0_i32_1 = arith.constant 0 : i32
    return %c0_i32, %c0_i32_0 : i32, i32
  }
  func.func @transform_4(%arg0: i32) -> (i32, i32) {
    %c0_i32 = arith.constant 0 : i32
    %c0_i32_0 = arith.constant 0 : i32
    %c0_i32_1 = arith.constant 0 : i32
    return %c0_i32, %c0_i32_0 : i32, i32
  }
  func.func @transform_5(%arg0: i32) -> (i32, i32) {
    %c0_i32 = arith.constant 0 : i32
    %c0_i32_0 = arith.constant 0 : i32
    return %arg0, %c0_i32 : i32, i32
  }
}

</mosaic_0001>

<bundles_post_ra>
// kernel: tpu_custom_call.1
= control target key start
LH: loop header
LB: loop body
LE: loop exit
PB: predicated region body
PF: predicated region fallthrough
CT: control target
= control target key end

     0   :  { %vm29_vm0 = vcmask 261120   ;;  %vm66_vm1 = vcmask 523264   ;;  %vm90_vm2 = vcmask 23552   ;;  %s178_s1 = inlined_call_operand.vmem [shape: f32[32,64], index: 1, kind: input, shape index: {}]   ;;  %s179_s3 = inlined_call_operand.vmem [shape: f32[64,3], index: 3, kind: input, shape index: {}]   ;;  %s180_s0 = inlined_call_operand.vmem [shape: f32[8,32], index: 0, kind: input, shape index: {}]   ;;  %s181_s2 = inlined_call_operand.vmem [shape: f32[1,64], index: 2, kind: input, shape index: {}]   ;;  %s182_s4 = inlined_call_operand.vmem [shape: f32[1,3], index: 4, kind: input, shape index: {}]   ;;  %s183_s5 = inlined_call_operand.vmem [shape: f32[8,3], index: 5, kind: output, shape index: {}]  }
   0x1   :  { %v24_v0 = vld [vmem:[%s178_s1 + $0x18] sm:$0xff]  ;;  %v23_v1 = vld [vmem:[%s178_s1 + $0x10] sm:$0xff]  ;;  %v22_v3 = vld [vmem:[%s178_s1 + $0x8] sm:$0xff] }
   0x2   :  { %45 = vmatpush.msra.mxu0 %v24_v0  ;;  %v61_v2 = vld [vmem:[%s179_s3 + $0x38] sm:$0xff]  ;;  %v60_v4 = vld [vmem:[%s179_s3 + $0x30] sm:$0xff]  ;;  %v59_v5 = vld [vmem:[%s179_s3 + $0x28] sm:$0xff] }
   0x3   :  { %78 = vmatpush.msra.mxu1 %v61_v2  ;;  %v21_v6 = vld [vmem:[%s178_s1] sm:$0xff]  ;;  %v57_v9 = vld [vmem:[%s179_s3 + $0x18] sm:$0xff]  ;;  %v56_v10 = vld [vmem:[%s179_s3 + $0x10] sm:$0xff] }
   0x4   :  { %46 = vmatpush.msra.mxu0 %v23_v1  ;;  %v20_v7 = vld [vmem:[%s180_s0] sm:$0xff]  ;;  %v55_v11 = vld [vmem:[%s179_s3 + $0x8] sm:$0xff] }
   0x5   :  { %79 = vmatpush.msra.mxu1 %v60_v4  ;;  %v58_v8 = vld [vmem:[%s179_s3 + $0x20] sm:$0xff] }
   0x6   :  { %47 = vmatpush.msra.mxu0 %v22_v3  ;;  %v54_v12 = vld [vmem:[%s179_s3] sm:$0xff] }
   0x7   :  { %80 = vmatpush.msra.mxu1 %v59_v5  ;;  %v98_v13 = vld [vmem:[%s181_s2] ss:$0 sm:$0xff] }
   0x8   :  { %48 = vmatpush.msra.mxu0 %v21_v6  ;;  %v99_v17 = vld [vmem:[%s182_s4] ss:$0 sm:$0xff] }
   0x9   :  { %96 = vmatmul.msk.f32.vlgmr.msra.gmra.mxu0 %vm29_vm0, %v20_v7  ;;  %81 = vmatpush.msra.mxu1 %v58_v8 }
   0xb   :  { %82 = vmatpush.msra.mxu1 %v57_v9 }
   0xd   :  { %83 = vmatpush.msra.mxu1 %v56_v10 }
   0xf   :  { %84 = vmatpush.msra.mxu1 %v55_v11 }
  0x11   :  { %85 = vmatpush.msra.mxu1 %v54_v12 }
  0x86   :  { %v50_v14 = vpop.f32.mrf.mxu0 }
  0x87   :  { %v51_v15 = vadd.f32 %v98_v13, %v50_v14 }
  0x89   :  { %v53_v16 = vmax.f32 %v51_v15, 0.0 }
  0x8b   :  { %97 = vmatmul.msk.f32.vlgmr.msra.gmra.mxu1 %vm66_vm1, %v53_v16 }
 0x108   :  { %v87_v18 = vpop.f32.mrf.mxu1 }
 0x109   :  { %v88_v19 = vadd.f32 %v99_v17, %v87_v18 }
 0x10b   :  { %91 = vst.msk [vmem:[%s183_s5] sm:$0xff] %vm90_vm2, %v88_v19 }

</bundles_post_ra>
